<compile_context>
chip_gen: v6e
topology: v6e:2x2x1
jax: 0.10.0
libtpu: 0.0.40
codegen_flags: <defaults>
</compile_context>

<pallas_src>
import functools

import jax
import jax.numpy as jnp
from jax.experimental import pallas as pl
from jax.experimental.pallas import tpu as pltpu


def rawnet_kernel(xt_ref, w1_ref, b1_ref, w2_ref, b2_ref, w3_ref, b3_ref, o_ref,
                  *, act_dtype):
    # xt_ref : (2, T) f32   transposed input tile (batch on lanes)
    # w1_ref : (H, 2) f32   fc1 weight (PyTorch (out, in) layout)
    # b1_ref : (H, 1) f32
    # w2_ref : (H, H)       fc2 weight (act_dtype: f32 or bf16)
    # b2_ref : (H, 1) f32
    # w3_ref : (H, 1) f32   fc3 weight transposed
    # b3_ref : (1, 1) f32
    # o_ref  : (1, T) f32   lane-dense output row
    xt = xt_ref[...]
    w1 = w1_ref[...]

    # Layer 1: K=2 -> two VPU broadcast-FMAs in f32; tanh on the EUP in act_dtype.
    pre1 = w1[:, 0:1] * xt[0:1, :] + w1[:, 1:2] * xt[1:2, :] + b1_ref[...]   # (H, T)
    h1 = jnp.tanh(pre1.astype(act_dtype))                                    # (H, T)

    # Layer 2: the one real matmul on the MXU, act_dtype operands, f32 accumulation.
    pre2 = jnp.dot(w2_ref[...], h1, preferred_element_type=jnp.float32) + b2_ref[...]
    h2 = jnp.tanh(pre2.astype(act_dtype))                                    # (H, T)

    # Layer 3: out-dim 1 -> VPU multiply (promoted to f32) + sublane reduce (XLU).
    pre3 = jnp.sum(h2.astype(jnp.float32) * w3_ref[...], axis=0, keepdims=True) \
        + b3_ref[...]                                                        # (1, T)
    o_ref[...] = jax.nn.sigmoid(pre3).astype(o_ref.dtype)


def _tpu_kind():
    try:
        return jax.devices()[0].device_kind.lower()
    except Exception:
        return ""


def rawnet_forward(x, params, *, tile_n=16384, feature_major=False, act_dtype=None):
    """Fused RawNet forward.

    x: (N, 2) float32, or (2, N) if feature_major=True (skips the transpose pass).
    params: PyTorch-layout weights + column biases (see init_params).
    """
    assert tile_n % 128 == 0
    h = params["w1"].shape[0]

    kind = _tpu_kind()
    if act_dtype is None:
        # bf16 EUP/VPU exists on v6e and v7x; v5e and older fall back to f32.
        bf16_ok = any(t in kind for t in ("v6", "6e", "v7", "7x"))
        act_dtype = jnp.bfloat16 if bf16_ok else jnp.float32
    multi_tc = ("v7" in kind) or ("7x" in kind)   # 2 TensorCores per chip

    if feature_major:
        n = x.shape[1]
        xt = x.astype(jnp.float32)                # (2, N), no extra HBM pass
    else:
        n = x.shape[0]
        xt = x.astype(jnp.float32).T              # (2, N)

    # Tile selection: big tiles to amortize per-grid-step overhead; on v7x make sure
    # the "parallel" batch axis has >= 2 steps so both TensorCores get work.
    n_lane = ((n + 127) // 128) * 128
    tile = min(tile_n, n_lane)
    if multi_tc and n_lane >= 256 and n_lane // tile < 2:
        tile = max(128, ((n_lane // 2) + 127) // 128 * 128)
    n_pad = ((n_lane + tile - 1) // tile) * tile
    grid = (n_pad // tile,)

    # Pad only the ragged tail (padded lanes produce finite junk, sliced off below).
    if n_pad != n:
        xt = jnp.pad(xt, ((0, 0), (0, n_pad - n)))

    # Resident weights: w2 is pre-cast to the activation dtype (bf16 halves MXU
    # passes + operand load on v6e/v7x); everything else stays f32.
    w2 = params["w2"].astype(act_dtype)

    const = lambda i: (0, 0)  # weights/biases stay resident across the grid
    kernel = functools.partial(rawnet_kernel, act_dtype=act_dtype)

    out = pl.pallas_call(
        kernel,
        out_shape=jax.ShapeDtypeStruct((1, n_pad), jnp.float32),
        grid=grid,
        in_specs=[
            pl.BlockSpec((2, tile), lambda i: (0, i)),   # x tile
            pl.BlockSpec((h, 2), const),                 # w1
            pl.BlockSpec((h, 1), const),                 # b1
            pl.BlockSpec((h, h), const),                 # w2 (act_dtype)
            pl.BlockSpec((h, 1), const),                 # b2
            pl.BlockSpec((h, 1), const),                 # w3
            pl.BlockSpec((1, 1), const),                 # b3
        ],
        out_specs=pl.BlockSpec((1, tile), lambda i: (0, i)),
        compiler_params=pltpu.CompilerParams(
            dimension_semantics=("parallel",),           # megacore-shard batch on v7x
            vmem_limit_bytes=32 * 1024 * 1024,           # headroom on v5e (16 MiB default)
        ),
        cost_estimate=pl.CostEstimate(
            flops=2 * n_pad * (2 * h + h * h + h),
            transcendentals=n_pad * (2 * h + 1),
            bytes_accessed=4 * (3 * n_pad + 2 * h + h + h + h + 1) + h * h * w2.dtype.itemsize,
        ),
    )(
        xt,
        params["w1"], params["b1"],
        w2, params["b2"],
        params["w3"], params["b3"],
    )
    return out[0, :n].reshape(n, 1)


def init_params(key, num_hid):
    """Deterministic init mimicking nn.Linear's U(-1/sqrt(fan_in), 1/sqrt(fan_in))."""
    ks = jax.random.split(key, 6)

    def lin(kw, kb, fan_in, fan_out):
        bound = float(fan_in) ** -0.5
        # PyTorch layout: weight (out, in); bias stored as a column (out, 1).
        w = jax.random.uniform(kw, (fan_out, fan_in), jnp.float32, -bound, bound)
        b = jax.random.uniform(kb, (fan_out, 1), jnp.float32, -bound, bound)
        return w, b

    w1, b1 = lin(ks[0], ks[1], 2, num_hid)          # (H,2), (H,1)
    w2, b2 = lin(ks[2], ks[3], num_hid, num_hid)    # (H,H), (H,1)
    w3t, b3 = lin(ks[4], ks[5], num_hid, 1)         # (1,H), (1,1)
    return {"w1": w1, "b1": b1, "w2": w2, "b2": b2, "w3": w3t.T, "b3": b3}


def rawnet_ref(x, p):
    """Pure-JAX f32 reference (standard row-major formulation)."""
    h1 = jnp.tanh(x @ p["w1"].T + p["b1"].T)
    h2 = jnp.tanh(h1 @ p["w2"].T + p["b2"].T)
    return jax.nn.sigmoid(h2 @ p["w3"] + p["b3"])


if __name__ == "__main__":
    key = jax.random.PRNGKey(0)
    k_param, k_x = jax.random.split(key)

    num_hid = 32
    batch = 8

    params = init_params(k_param, num_hid)
    x = jax.random.normal(k_x, (batch, 2), dtype=jnp.float32)

    out = rawnet_forward(x, params)
    out = jax.block_until_ready(out)

    ref = rawnet_ref(x, params)
    assert out.shape == (batch, 1), out.shape
    # Tolerance covers the bf16-tanh path on v6e/v7x (f32 path is far tighter).
    assert jnp.allclose(out, ref, atol=2e-2, rtol=2e-2), (out, ref)

    print("KERNEL_OK")
</pallas_src>

<mosaic_0001>
module attributes {stable_mosaic.version = 11 : i64} {
  func.func @rawnet_kernel(%arg0: i32, %arg1: memref<2x128xf32, #tpu.memory_space<vmem>>, %arg2: memref<32x2xf32, #tpu.memory_space<vmem>>, %arg3: memref<32x1xf32, #tpu.memory_space<vmem>>, %arg4: memref<32x32xf32, #tpu.memory_space<vmem>>, %arg5: memref<32x1xf32, #tpu.memory_space<vmem>>, %arg6: memref<32x1xf32, #tpu.memory_space<vmem>>, %arg7: memref<1x1xf32, #tpu.memory_space<vmem>>, %arg8: memref<1x128xf32, #tpu.memory_space<vmem>>) attributes {dimension_semantics = [#tpu.dimension_semantics<parallel>], iteration_bounds = array<i64: 1>, scalar_prefetch = 0 : i64, scratch_operands = 0 : i64, tpu.core_type = #tpu.core_type<tc>, window_params = [{transform_indices = @transform_0, window_bounds = array<i64: 2, 128>}, {pipeline_mode = #tpu.pipeline_mode<synchronous>, transform_indices = @transform_1, window_bounds = array<i64: 32, 2>}, {pipeline_mode = #tpu.pipeline_mode<synchronous>, transform_indices = @transform_2, window_bounds = array<i64: 32, 1>}, {pipeline_mode = #tpu.pipeline_mode<synchronous>, transform_indices = @transform_3, window_bounds = array<i64: 32, 32>}, {pipeline_mode = #tpu.pipeline_mode<synchronous>, transform_indices = @transform_4, window_bounds = array<i64: 32, 1>}, {pipeline_mode = #tpu.pipeline_mode<synchronous>, transform_indices = @transform_5, window_bounds = array<i64: 32, 1>}, {pipeline_mode = #tpu.pipeline_mode<synchronous>, transform_indices = @transform_6, window_bounds = array<i64: 1, 1>}, {transform_indices = @transform_7, window_bounds = array<i64: 1, 128>}]} {
    %c0 = arith.constant 0 : index
    %c0_0 = arith.constant 0 : index
    %0 = vector.load %arg1[%c0, %c0_0] : memref<2x128xf32, #tpu.memory_space<vmem>>, vector<2x128xf32>
    %c0_1 = arith.constant 0 : index
    %c0_2 = arith.constant 0 : index
    %1 = vector.load %arg2[%c0_1, %c0_2] : memref<32x2xf32, #tpu.memory_space<vmem>>, vector<32x2xf32>
    %2 = vector.extract_strided_slice %1 {offsets = [0, 0], sizes = [32, 1], strides = [1, 1]} : vector<32x2xf32> to vector<32x1xf32>
    %3 = vector.extract_strided_slice %0 {offsets = [0, 0], sizes = [1, 128], strides = [1, 1]} : vector<2x128xf32> to vector<1x128xf32>
    %4 = vector.broadcast %2 : vector<32x1xf32> to vector<32x128xf32>
    %5 = vector.broadcast %3 : vector<1x128xf32> to vector<32x128xf32>
    %6 = arith.mulf %4, %5 : vector<32x128xf32>
    %7 = vector.extract_strided_slice %1 {offsets = [0, 1], sizes = [32, 1], strides = [1, 1]} : vector<32x2xf32> to vector<32x1xf32>
    %8 = vector.extract_strided_slice %0 {offsets = [1, 0], sizes = [1, 128], strides = [1, 1]} : vector<2x128xf32> to vector<1x128xf32>
    %9 = vector.broadcast %7 : vector<32x1xf32> to vector<32x128xf32>
    %10 = vector.broadcast %8 : vector<1x128xf32> to vector<32x128xf32>
    %11 = arith.mulf %9, %10 : vector<32x128xf32>
    %12 = arith.addf %6, %11 : vector<32x128xf32>
    %c0_3 = arith.constant 0 : index
    %c0_4 = arith.constant 0 : index
    %13 = vector.load %arg3[%c0_3, %c0_4] : memref<32x1xf32, #tpu.memory_space<vmem>>, vector<32x1xf32>
    %14 = vector.broadcast %13 : vector<32x1xf32> to vector<32x128xf32>
    %15 = arith.addf %12, %14 : vector<32x128xf32>
    %16 = math.tanh %15 : vector<32x128xf32>
    %c0_5 = arith.constant 0 : index
    %c0_6 = arith.constant 0 : index
    %17 = vector.load %arg4[%c0_5, %c0_6] : memref<32x32xf32, #tpu.memory_space<vmem>>, vector<32x32xf32>
    %cst = arith.constant dense<0.000000e+00> : vector<32x128xf32>
    %18 = tpu.matmul %17, %16, %cst {dimension_numbers = #tpu.dot_dimension_numbers<[1], [0], [0], [1], [0, 0, 1, 1], [], []>} : vector<32x32xf32>, vector<32x128xf32>, vector<32x128xf32> -> vector<32x128xf32>
    %c0_7 = arith.constant 0 : index
    %c0_8 = arith.constant 0 : index
    %19 = vector.load %arg5[%c0_7, %c0_8] : memref<32x1xf32, #tpu.memory_space<vmem>>, vector<32x1xf32>
    %20 = vector.broadcast %19 : vector<32x1xf32> to vector<32x128xf32>
    %21 = arith.addf %18, %20 : vector<32x128xf32>
    %22 = math.tanh %21 : vector<32x128xf32>
    %c0_9 = arith.constant 0 : index
    %c0_10 = arith.constant 0 : index
    %23 = vector.load %arg6[%c0_9, %c0_10] : memref<32x1xf32, #tpu.memory_space<vmem>>, vector<32x1xf32>
    %24 = vector.broadcast %23 : vector<32x1xf32> to vector<32x128xf32>
    %25 = arith.mulf %22, %24 : vector<32x128xf32>
    %cst_11 = arith.constant dense<0.000000e+00> : vector<128xf32>
    %26 = vector.multi_reduction <add>, %25, %cst_11 [0] : vector<32x128xf32> to vector<128xf32>
    %27 = vector.shape_cast %26 : vector<128xf32> to vector<1x128xf32>
    %c0_12 = arith.constant 0 : index
    %c0_13 = arith.constant 0 : index
    %28 = vector.load %arg7[%c0_12, %c0_13] : memref<1x1xf32, #tpu.memory_space<vmem>>, vector<1x1xf32>
    %29 = vector.broadcast %28 : vector<1x1xf32> to vector<1x128xf32>
    %30 = arith.addf %27, %29 : vector<1x128xf32>
    %31 = arith.negf %30 : vector<1x128xf32>
    %32 = math.exp %31 : vector<1x128xf32>
    %cst_14 = arith.constant 1.000000e+00 : f32
    %33 = vector.broadcast %cst_14 : f32 to vector<1x128xf32>
    %34 = arith.addf %33, %32 : vector<1x128xf32>
    %35 = arith.divf %33, %34 : vector<1x128xf32>
    %c0_15 = arith.constant 0 : index
    %c0_16 = arith.constant 0 : index
    %36 = vector.load %arg8[%c0_15, %c0_16] : memref<1x128xf32, #tpu.memory_space<vmem>>, vector<1x128xf32>
    tpu.vector_store %arg8[%c0_15, %c0_16], %35 {strides = array<i32>} : memref<1x128xf32, #tpu.memory_space<vmem>>, vector<1x128xf32>,
    return
  }
  func.func @transform_0(%arg0: i32) -> (i32, i32) {
    %c0_i32 = arith.constant 0 : i32
    %c0_i32_0 = arith.constant 0 : i32
    return %c0_i32, %arg0 : i32, i32
  }
  func.func @transform_1(%arg0: i32) -> (i32, i32) {
    %c0_i32 = arith.constant 0 : i32
    %c0_i32_0 = arith.constant 0 : i32
    %c0_i32_1 = arith.constant 0 : i32
    return %c0_i32, %c0_i32_0 : i32, i32
  }
  func.func @transform_2(%arg0: i32) -> (i32, i32) {
    %c0_i32 = arith.constant 0 : i32
    %c0_i32_0 = arith.constant 0 : i32
    %c0_i32_1 = arith.constant 0 : i32
    return %c0_i32, %c0_i32_0 : i32, i32
  }
  func.func @transform_3(%arg0: i32) -> (i32, i32) {
    %c0_i32 = arith.constant 0 : i32
    %c0_i32_0 = arith.constant 0 : i32
    %c0_i32_1 = arith.constant 0 : i32
    return %c0_i32, %c0_i32_0 : i32, i32
  }
  func.func @transform_4(%arg0: i32) -> (i32, i32) {
    %c0_i32 = arith.constant 0 : i32
    %c0_i32_0 = arith.constant 0 : i32
    %c0_i32_1 = arith.constant 0 : i32
    return %c0_i32, %c0_i32_0 : i32, i32
  }
  func.func @transform_5(%arg0: i32) -> (i32, i32) {
    %c0_i32 = arith.constant 0 : i32
    %c0_i32_0 = arith.constant 0 : i32
    %c0_i32_1 = arith.constant 0 : i32
    return %c0_i32, %c0_i32_0 : i32, i32
  }
  func.func @transform_6(%arg0: i32) -> (i32, i32) {
    %c0_i32 = arith.constant 0 : i32
    %c0_i32_0 = arith.constant 0 : i32
    %c0_i32_1 = arith.constant 0 : i32
    return %c0_i32, %c0_i32_0 : i32, i32
  }
  func.func @transform_7(%arg0: i32) -> (i32, i32) {
    %c0_i32 = arith.constant 0 : i32
    %c0_i32_0 = arith.constant 0 : i32
    return %c0_i32, %arg0 : i32, i32
  }
}

</mosaic_0001>

<bundles_post_ra>
// kernel: tpu_custom_call.1
= control target key start
LH: loop header
LB: loop body
LE: loop exit
PB: predicated region body
PF: predicated region fallthrough
CT: control target
= control target key end

     0   :  { %s532_s0 = inlined_call_operand.vmem [shape: f32[2,128], index: 0, kind: input, shape index: {}]   ;;  %s533_s1 = inlined_call_operand.vmem [shape: f32[32,2], index: 1, kind: input, shape index: {}]   ;;  %s534_s2 = inlined_call_operand.vmem [shape: f32[32,1], index: 2, kind: input, shape index: {}]   ;;  %s535_s3 = inlined_call_operand.vmem [shape: f32[32,32], index: 3, kind: input, shape index: {}]   ;;  %s536_s4 = inlined_call_operand.vmem [shape: f32[32,1], index: 4, kind: input, shape index: {}]   ;;  %s537_s5 = inlined_call_operand.vmem [shape: f32[32,1], index: 5, kind: input, shape index: {}]   ;;  %s538_s6 = inlined_call_operand.<no memory space> [shape: f32[1,1], index: 6, kind: input, shape index: {}]   ;;  %s539_s7 = inlined_call_operand.hbm [shape: f32[1,128], index: 7, kind: output, shape index: {}]  }
   0x1   :  { %v12_v0 = vstv %s538_s6 }
   0x2   :  { %13 = vst [vmem:[#allocation2] sm:$0x1] %v12_v0 }
   0x3   :  { %v33_v1 = vld [vmem:[%s533_s1 + $0x18] sm:$0xff]  ;;  %v32_v2 = vld [vmem:[%s533_s1 + $0x10] sm:$0xff]  ;;  %v408_v3 = vmov 1   ;;  %v409_v4 = vmov 0   ;;  %v31_v5 = vld [vmem:[%s533_s1 + $0x8] sm:$0xff] }
   0x4   :  { %359 = vset.pattern.permute.xlu0 %v408_v3  ;;  %360 = vset.pattern.permute.xlu1 %v409_v4 }
   0x5   :  { %75 = vperm.xlu0 %359, %v33_v1   ;;  %46 = vperm.xlu1 %360, %v32_v2  }
   0x9   :  { %361 = vset.pattern.permute.xlu1 %v408_v3  ;;  %67 = vperm.xlu0 %359, %v31_v5  }
   0xa   :  { %14 = vsyncpa [#allocation4], 0  ;;  %71 = vperm.xlu1 %361, %v32_v2   ;;  %v30_v6 = vld [vmem:[%s533_s1] sm:$0xff]  ;;  %v93_v7 = vld [vmem:[%s534_s2 + $0x18] sm:$0xff]  ;;  %vm150_vm0 = vcmask 261120   ;;  %v54_v22 = vlaneseq }
   0xb   :  { %v91_v8 = vld [vmem:[%s534_s2 + $0x8] sm:$0xff]  ;;  %v126_v9 = vld [vmem:[%s536_s4] sm:$0xff]  ;;  %v92_v10 = vld [vmem:[%s534_s2 + $0x10] sm:$0xff] }
   0xc   :  { %v128_v11 = vld [vmem:[%s536_s4 + $0x10] sm:$0xff]  ;;  %v90_v12 = vld [vmem:[%s534_s2] sm:$0xff]  ;;  %v127_v14 = vld [vmem:[%s536_s4 + $0x8] sm:$0xff]  ;;  %v510_v23 = vshrl.u32 %v54_v22, 7 }
   0xd   :  { %363 = vset.pattern.permute.xlu0 %v409_v4  ;;  %v252_v13 = vld [vmem:[%s537_s5] sm:$0xff]  ;;  %v254_v15 = vld [vmem:[%s537_s5 + $0x10] sm:$0xff]  ;;  %v129_v16 = vld [vmem:[%s536_s4 + $0x18] sm:$0xff] }
   0xe   :  { %362 = vset.pattern.permute.xlu1 %v409_v4  ;;  %51 = vperm.xlu0 %363, %v33_v1   ;;  %v289_v17 = vld [vmem:[#allocation2] sm:$0x1]  ;;  %v253_v18 = vld [vmem:[%s537_s5 + $0x8] sm:$0xff]  ;;  %v124_v20 = vld [vmem:[%s535_s3 + $0x10] sm:$0xff]  ;;  %v80_v26 = vsub.s32 1, %v510_v23  ;;  %v56_v27 = vsub.s32 0, %v510_v23 }
   0xf   :  { %41 = vperm.xlu1 %362, %v31_v5   ;;  %v122_v19 = vld [vmem:[%s535_s3] sm:$0xff]  ;;  %v255_v21 = vld [vmem:[%s537_s5 + $0x18] sm:$0xff]  ;;  %345 = vmatprep.mubr.msk.f32.mxu1 %vm150_vm0, %v124_v20  ;;  %v123_v61 = vld [vmem:[%s535_s3 + $0x8] sm:$0xff] }
  0x10   :  { %342 = vmatprep.mubr.msk.f32.mxu0 %vm150_vm0, %v122_v19  ;;  %v29_v29 = vld [vmem:[%s532_s0] sm:$0x3]  ;;  %v125_v62 = vld [vmem:[%s535_s3 + $0x18] sm:$0xff]  ;;  %s410_s3 = smov [#allocation3]  }
  0x11   :  { %v81_v31 = vrot.slane %v29_v29, %v80_v26  ;;  %v57_v32 = vrot.slane %v29_v29, %v56_v27  ;;  %s313_s15 = sshll.u32 %s410_s3, 4  ;;  %s314_s15 = int_to_ptr.vmem [resolvable:$true] %s313_s15 }
  0x12   :  { %36 = vperm.xlu0 %363, %v30_v6   ;;  %s386_s16 = scalar_lea.vmem %s314_s15, 16  ;;  %s390_s1 = scalar_lea.vmem %s314_s15, 32 }
  0x13   :  { %111 = vperm.xlu1 %362, %v93_v7   ;;  %p387_p0 = scmp.ne.s32.totalorder %s314_s15, %s386_s16  ;;  %p391_p1 = scmp.lt.s32.totalorder %s314_s15, %s314_s15 }
  0x14   :  { %p392_p2 = scmp.lt.s32.totalorder %s390_s1, %s386_s16 }
  0x16   :  { %101 = vperm.xlu0 %363, %v91_v8   ;;  %p393_p3 = por %p392_p2, %p391_p1 }
  0x17   :  { %364 = vset.pattern.permute.xlu1 %v408_v3 }
  0x18   :  { %63 = vperm.xlu1 %364, %v30_v6   ;;  %p394_p4 = pnand %p393_p3, %p387_p0 }
  0x1a   :  { %132 = vperm.xlu0 %363, %v126_v9  }
  0x1c   :  { %365 = vset.pattern.permute.xlu1 %v409_v4 }
  0x1d   :  { %106 = vperm.xlu1 %365, %v92_v10  }
  0x1e   :  { %142 = vperm.xlu0 %363, %v128_v11  }
  0x21   :  { %96 = vperm.xlu1 %365, %v90_v12  }
  0x22   :  { %258 = vperm.xlu0 %363, %v252_v13  }
  0x25   :  { %137 = vperm.xlu1 %365, %v127_v14  }
  0x26   :  { %268 = vperm.xlu0 %363, %v254_v15  }
  0x29   :  { %147 = vperm.xlu1 %365, %v129_v16  }
  0x2a   :  { %292 = vperm.xlu0 %363, %v289_v17  }
  0x2d   :  { %263 = vperm.xlu1 %365, %v253_v18  }
  0x31   :  { %273 = vperm.xlu1 %365, %v255_v21  }
  0x80   :  { %v47_v24 = vpop.permute.xlu1 %46  ;;  %v76_v25 = vpop.permute.xlu0 %75 }
  0x81   :  { %v85_v33 = vmul.f32 %v81_v31, %v76_v25  ;;  %v60_v45 = vmul.f32 %v57_v32, %v47_v24 }
  0x84   :  { %v68_v28 = vpop.permute.xlu0 %67 }
  0x85   :  { %v72_v30 = vpop.permute.xlu1 %71  ;;  %v83_v42 = vmul.f32 %v81_v31, %v68_v28 }
  0x86   :  { %v84_v41 = vmul.f32 %v81_v31, %v72_v30 }
  0x88   :  { %v88_v50 = vadd.f32 %v84_v41, %v60_v45 }
  0x89   :  { %v52_v34 = vpop.permute.xlu0 %51 }
  0x8a   :  { %v61_v35 = vmul.f32 %v57_v32, %v52_v34  ;;  %v42_v36 = vpop.permute.xlu1 %41 }
  0x8b   :  { %v59_v43 = vmul.f32 %v57_v32, %v42_v36 }
  0x8c   :  { %v89_v37 = vadd.f32 %v85_v33, %v61_v35 }
  0x8d   :  { %v37_v40 = vpop.permute.xlu0 %36  ;;  %v87_v48 = vadd.f32 %v83_v42, %v59_v43 }
  0x8e   :  { %v112_v38 = vpop.permute.xlu1 %111  ;;  %v58_v47 = vmul.f32 %v57_v32, %v37_v40 }
  0x8f   :  { %v117_v39 = vadd.f32 %v112_v38, %v89_v37 }
  0x91   :  { %366 = vtanh.f32 %v117_v39  ;;  %v102_v46 = vpop.permute.xlu0 %101 }
  0x92   :  { %v115_v52 = vadd.f32 %v102_v46, %v87_v48 }
  0x93   :  { %v64_v44 = vpop.permute.xlu1 %63 }
  0x94   :  { %v82_v49 = vmul.f32 %v81_v31, %v64_v44 }
  0x95   :  { %v133_v63 = vpop.permute.xlu0 %132 }
  0x96   :  { %v86_v54 = vadd.f32 %v82_v49, %v58_v47 }
  0x98   :  { %v107_v51 = vpop.permute.xlu1 %106 }
  0x99   :  { %v116_v53 = vadd.f32 %v107_v51, %v88_v50  ;;  %v143_v3 = vpop.permute.xlu0 %142 }
  0x9b   :  { %368 = vtanh.f32 %v116_v53 }
  0x9c   :  { %v97_v55 = vpop.permute.xlu1 %96  ;;  %370 = vtanh.f32 %v115_v52 }
  0x9d   :  { %v114_v56 = vadd.f32 %v97_v55, %v86_v54  ;;  %v259_v11 = vpop.permute.xlu0 %258 }
  0x9e   :  { %v367_v57 = vpop.eup %366 }
  0x9f   :  { %372 = vtanh.f32 %v114_v56  ;;  %334 = vmatprep.subr.mxu0 %v367_v57  ;;  %348 = vmatprep.subr.mxu1 %v367_v57 }
  0xa0   :  { %335 = vmatpush3.msra.mxu0 %v367_v57  ;;  %352 = vmatpush3.msra.mxu1 %v367_v57  ;;  %v138_v0 = vpop.permute.xlu1 %137 }
  0xa1   :  { %v269_v19 = vpop.permute.xlu0 %268 }
  0xa4   :  { %v148_v4 = vpop.permute.xlu1 %147 }
  0xa5   :  { %v293_v32 = vpop.permute.xlu0 %292 }
  0xa6   :  { %v298_v34 = vrot.slane %v293_v32, %v56_v27 }
  0xa8   :  { %v369_v58 = vpop.eup %368  ;;  %v264_v13 = vpop.permute.xlu1 %263 }
  0xa9   :  { %336 = vmatprep.subr.mxu0 %v369_v58  ;;  %349 = vmatprep.subr.mxu1 %v369_v58  ;;  %v371_v59 = vpop.eup %370 }
  0xaa   :  { %337 = vmatpush3.msra.mxu0 %v369_v58  ;;  %353 = vmatpush3.msra.mxu1 %v369_v58 }
  0xab   :  { %338 = vmatprep.subr.mxu0 %v371_v59  ;;  %350 = vmatprep.subr.mxu1 %v371_v59 }
  0xac   :  { %v373_v60 = vpop.eup %372  ;;  %339 = vmatpush3.msra.mxu0 %v371_v59  ;;  %354 = vmatpush3.msra.mxu1 %v371_v59  ;;  %v274_v22 = vpop.permute.xlu1 %273 }
  0xad   :  { %340 = vmatprep.subr.mxu0 %v373_v60  ;;  %351 = vmatprep.subr.mxu1 %v373_v60 }
  0xae   :  { %341 = vmatpush3.msra.mxu0 %v373_v60  ;;  %355 = vmatpush3.msra.mxu1 %v373_v60 }
  0xaf   :  { %343 = vmatmul.mubr.msk.f32.vlgmr.msra.gmra.mxu0 %vm150_vm0, %v123_v61  ;;  %346 = vmatmul.mubr.msk.f32.vlgmr.msra.gmra.mxu1 %vm150_vm0, %v125_v62 }
 0x16f   :  { %v344_v1 = vpop.f32.mrf.mxu0  ;;  %v347_v2 = vpop.f32.mrf.mxu1 }
 0x170   :  { %v235_v5 = vadd.f32 %v344_v1, %v138_v0  ;;  %v245_v8 = vadd.f32 %v347_v2, %v148_v4 }
 0x171   :  { %v229_v6 = vpop.f32.mrf.mxu0  ;;  %v239_v7 = vpop.f32.mrf.mxu1 }
 0x172   :  { %374 = vtanh.f32 %v235_v5  ;;  %v230_v9 = vadd.f32 %v229_v6, %v133_v63  ;;  %v240_v10 = vadd.f32 %v239_v7, %v143_v3 }
 0x174   :  { %376 = vtanh.f32 %v230_v9 }
 0x175   :  { %378 = vtanh.f32 %v240_v10 }
 0x176   :  { %380 = vtanh.f32 %v245_v8 }
 0x17f   :  { %v375_v12 = vpop.eup %374 }
 0x180   :  { %v277_v16 = vmul.f32 %v375_v12, %v264_v13 }
 0x181   :  { %v377_v14 = vpop.eup %376 }
 0x182   :  { %v379_v15 = vpop.eup %378  ;;  %v276_v17 = vmul.f32 %v377_v14, %v259_v11 }
 0x183   :  { %v381_v18 = vpop.eup %380  ;;  %v278_v21 = vmul.f32 %v379_v15, %v269_v19 }
 0x184   :  { %v280_v20 = vadd.f32 %v277_v16, %v276_v17  ;;  %v279_v24 = vmul.f32 %v381_v18, %v274_v22 }
 0x186   :  { %v281_v25 = vadd.f32 %v280_v20, %v278_v21 }
 0x188   :  { %v282_v26 = vadd.f32 %v281_v25, %v279_v24 }
 0x18a   :  { %v283_v28 = vrot.slane %v282_v26, 4 }
 0x18c   :  { %v284_v29 = vadd.f32 %v283_v28, %v282_v26 }
 0x18e   :  { %v285_v30 = vrot.slane %v284_v29, 2 }
 0x190   :  { %v286_v31 = vadd.f32 %v285_v30, %v284_v29 }
 0x192   :  { %v287_v33 = vrot.slane %v286_v31, 1 }
 0x194   :  { %v288_v35 = vadd.f32 %v287_v33, %v286_v31 }
 0x196   :  { %v299_v36 = vadd.f32 %v298_v34, %v288_v35 }
 0x198   :  { %v325_v37 = vmul.f32 -1.442695, %v299_v36 }
 0x19a   :  { %382 = vpow2.f32 %v325_v37 }
 0x1a7   :  { %v383_v38 = vpop.eup %382 }
 0x1a8   :  { %v303_v39 = vadd.f32 1.0, %v383_v38 }
 0x1aa   :  { %384 = vrcp.f32 %v303_v39 }
 0x1b7   :  { %v385_v40 = vpop.eup %384 }
 0x1b8   :  { %306 = vst [vmem:[#allocation3] sm:$0x1] %v385_v40 }
 0x1b9   :  { %397 = shalt.err (!%p394_p4)
}
 0x1ba   :  { %316 = dma.vmem_to_hbm [thread:$0]  %s314_s15, 16, %s539_s7, [#allocation4]  }
 0x1bb   :  { %406 = dma.done.wait [#allocation4], 16  }
 0x1bc   :  { %407 = vsyncadd [#allocation4], 4294967280 }
 0x1bd   :  { %320 = vsyncpa [#allocation4], 1 }

</bundles_post_ra>
